<compile_context>
chip_gen: v6e
topology: v6e:2x2x1
jax: 0.10.0
libtpu: 0.0.40
codegen_flags: <defaults>
</compile_context>

<pallas_src>
import jax
import jax.numpy as jnp
from jax.experimental import pallas as pl
from jax.experimental.pallas import tpu as pltpu


def _round_up(x, m):
    return ((x + m - 1) // m) * m


def _pad_to(a, shape):
    pads = [(0, t - s) for s, t in zip(a.shape, shape)]
    return jnp.pad(a, pads)


def _mlp_kernel(x_ref, w_in_ref, b_in_ref, w_hid_ref, b_hid_ref,
                w_out_ref, b_out_ref, o_ref, h_ref):
    """One grid step = one hidden layer `l` for one batch tile `i`.

    x_ref      : (TB, N_in_p)   compute dtype (fetched once per batch tile)
    w_in_ref   : (N_in_p, H_p)  compute dtype (resident)
    b_in_ref   : (1, H_p)       f32           (resident)
    w_hid_ref  : (H_p, H_p)     compute dtype (streamed per layer, dbl-buffered)
    b_hid_ref  : (1, H_p)       f32           (streamed per layer)
    w_out_ref  : (H_p, N_out_p) compute dtype (resident)
    b_out_ref  : (1, N_out_p)   f32           (resident)
    o_ref      : (TB, N_out_p)  out dtype     (written at last layer only)
    h_ref      : (TB, H_p)      f32 scratch   (running activation)
    """
    l = pl.program_id(1)
    n_l = pl.num_programs(1)

    # Input projection at the first layer step (no activation, as in forward()).
    @pl.when(l == 0)
    def _input_proj():
        h_ref[...] = (
            jnp.dot(x_ref[...], w_in_ref[...],
                    preferred_element_type=jnp.float32)
            + b_in_ref[...])

    # Hidden linear `l` (streamed weight tile), f32 accumulation.
    h = h_ref[...].astype(w_hid_ref.dtype)
    h_new = (jnp.dot(h, w_hid_ref[...], preferred_element_type=jnp.float32)
             + b_hid_ref[...])

    # ReLU after every hidden linear except the last one.
    @pl.when(l < n_l - 1)
    def _store_relu():
        h_ref[...] = jnp.maximum(h_new, 0.0)

    @pl.when(l >= n_l - 1)
    def _store_plain():
        h_ref[...] = h_new

    # Output projection at the last layer step (no activation).
    @pl.when(l == n_l - 1)
    def _output_proj():
        o_ref[...] = (
            jnp.dot(h_ref[...].astype(w_out_ref.dtype), w_out_ref[...],
                    preferred_element_type=jnp.float32)
            + b_out_ref[...]).astype(o_ref.dtype)


def prepare_params(params, compute_dtype=jnp.float32):
    """One-time parameter prep: transpose to (in, out), pad lanes to 128, cast.

    Do this once at load time — NOT per forward call — so no per-call HBM
    transpose traffic remains in front of the kernel.
    """
    w_in, b_in, w_hid, b_hid, w_out, b_out = params
    L, H, _ = w_hid.shape
    n_in = w_in.shape[1]
    n_out = w_out.shape[0]

    h_p = _round_up(H, 128)
    n_in_p = _round_up(n_in, 128)
    n_out_p = _round_up(n_out, 128)

    w_in_t = _pad_to(jnp.transpose(w_in), (n_in_p, h_p)).astype(compute_dtype)
    w_hid_t = _pad_to(jnp.transpose(w_hid, (0, 2, 1)),
                      (L, h_p, h_p)).astype(compute_dtype)
    w_out_t = _pad_to(jnp.transpose(w_out), (h_p, n_out_p)).astype(compute_dtype)

    # Biases stay in f32 (added to the f32 accumulator on the VPU).
    b_in_p = _pad_to(b_in.reshape(1, -1), (1, h_p)).astype(jnp.float32)
    b_hid_p = _pad_to(b_hid.reshape(L, 1, -1), (L, 1, h_p)).astype(jnp.float32)
    b_out_p = _pad_to(b_out.reshape(1, -1), (1, n_out_p)).astype(jnp.float32)

    return (w_in_t, b_in_p, w_hid_t, b_hid_p, w_out_t, b_out_p)


def net_forward(x, prepared, n_output, *, batch_tile=None):
    """Forward pass using pre-prepared (transposed/padded/cast) parameters."""
    w_in_t, b_in, w_hid_t, b_hid, w_out_t, b_out = prepared
    B, n_in = x.shape
    L, h_p, _ = w_hid_t.shape
    n_in_p = w_in_t.shape[0]
    n_out_p = w_out_t.shape[1]
    compute_dtype = w_in_t.dtype
    out_dtype = x.dtype

    # Batch tile: multiple of 8 sublanes, capped for VMEM; pad B to a multiple.
    if batch_tile is None:
        batch_tile = 256
    tb = min(_round_up(batch_tile, 8), _round_up(B, 8))
    b_p = _round_up(B, tb)

    x_p = _pad_to(x, (b_p, n_in_p)).astype(compute_dtype)

    # Rough resident-VMEM estimate (double-buffered tiles + resident weights
    # + h scratch); keep the scoped limit within every generation's physical
    # VMEM (v7x has only 64 MiB).
    cs = jnp.dtype(compute_dtype).itemsize
    os_ = jnp.dtype(out_dtype).itemsize
    est = (2 * (tb * n_in_p * cs            # x tile
                + tb * n_out_p * os_        # out tile
                + h_p * h_p * cs            # streamed hidden weight
                + h_p * 4                   # streamed hidden bias
                + n_in_p * h_p * cs         # resident w_in
                + h_p * n_out_p * cs        # resident w_out
                + h_p * 4 + n_out_p * 4)    # resident biases
           + tb * h_p * 4)                  # h scratch
    vmem_limit = int(min(64 * 2**20, max(32 * 2**20, 2 * est)))

    grid = (b_p // tb, L)

    out_p = pl.pallas_call(
        _mlp_kernel,
        out_shape=jax.ShapeDtypeStruct((b_p, n_out_p), out_dtype),
        grid_spec=pltpu.PrefetchScalarGridSpec(
            num_scalar_prefetch=0,
            grid=grid,
            in_specs=[
                pl.BlockSpec((tb, n_in_p), lambda i, l: (i, 0)),        # x
                pl.BlockSpec((n_in_p, h_p), lambda i, l: (0, 0)),       # w_in
                pl.BlockSpec((1, h_p), lambda i, l: (0, 0)),            # b_in
                pl.BlockSpec((None, h_p, h_p), lambda i, l: (l, 0, 0)),  # w_hid[l]
                pl.BlockSpec((None, 1, h_p), lambda i, l: (l, 0, 0)),    # b_hid[l]
                pl.BlockSpec((h_p, n_out_p), lambda i, l: (0, 0)),      # w_out
                pl.BlockSpec((1, n_out_p), lambda i, l: (0, 0)),        # b_out
            ],
            out_specs=pl.BlockSpec((tb, n_out_p), lambda i, l: (i, 0)),
            scratch_shapes=[pltpu.VMEM((tb, h_p), jnp.float32)],
        ),
        compiler_params=pltpu.CompilerParams(
            dimension_semantics=("parallel", "arbitrary"),
            vmem_limit_bytes=vmem_limit),
    )(x_p, w_in_t, b_in, w_hid_t, b_hid, w_out_t, b_out)

    return out_p[:B, :n_output]


def init_params(key, n_input, n_hidden, n_hidden_layers, n_output):
    """Deterministic synthetic init (PyTorch-Linear-style (out, in) shapes)."""
    ks = jax.random.split(key, 6)
    scale = 0.1
    w_in = scale * jax.random.normal(ks[0], (n_hidden, n_input), jnp.float32)
    b_in = scale * jax.random.normal(ks[1], (n_hidden,), jnp.float32)
    w_hid = scale * jax.random.normal(
        ks[2], (n_hidden_layers, n_hidden, n_hidden), jnp.float32)
    b_hid = scale * jax.random.normal(
        ks[3], (n_hidden_layers, n_hidden), jnp.float32)
    w_out = scale * jax.random.normal(ks[4], (n_output, n_hidden), jnp.float32)
    b_out = scale * jax.random.normal(ks[5], (n_output,), jnp.float32)
    return (w_in, b_in, w_hid, b_hid, w_out, b_out)


def net_forward_ref(x, params, n_hidden_layers):
    """Pure-JAX reference mirroring the PyTorch forward exactly (f32)."""
    w_in, b_in, w_hid, b_hid, w_out, b_out = params
    h = x @ w_in.T + b_in
    for l in range(n_hidden_layers):
        h = h @ w_hid[l].T + b_hid[l]
        if l < n_hidden_layers - 1:
            h = jnp.maximum(h, 0.0)
    return h @ w_out.T + b_out


if __name__ == "__main__":
    # Small shapes consistent with the module's constructor.
    N_INPUT, N_HIDDEN, N_HIDDEN_LAYERS, N_OUTPUT = 16, 32, 3, 4
    BATCH = 8

    key = jax.random.PRNGKey(0)
    k_x, k_p = jax.random.split(key)
    x = jax.random.normal(k_x, (BATCH, N_INPUT), jnp.float32)
    params = init_params(k_p, N_INPUT, N_HIDDEN, N_HIDDEN_LAYERS, N_OUTPUT)
    ref = net_forward_ref(x, params, N_HIDDEN_LAYERS)

    # f32 compute path (exact semantics of the PyTorch module).
    prep_f32 = prepare_params(params, compute_dtype=jnp.float32)
    out_f32 = jax.block_until_ready(net_forward(x, prep_f32, N_OUTPUT))
    assert out_f32.shape == (BATCH, N_OUTPUT)
    assert jnp.allclose(out_f32, ref, atol=1e-4, rtol=1e-4)

    # bf16 compute path (MXU-friendly; f32 accumulation), looser tolerance.
    prep_bf16 = prepare_params(params, compute_dtype=jnp.bfloat16)
    out_bf16 = jax.block_until_ready(net_forward(x, prep_bf16, N_OUTPUT))
    assert out_bf16.shape == (BATCH, N_OUTPUT)
    assert jnp.all(jnp.isfinite(out_bf16))
    assert jnp.allclose(out_bf16, ref, atol=1e-1, rtol=1e-1)

    print("KERNEL_OK")
</pallas_src>

<mosaic_0001>
module attributes {stable_mosaic.version = 11 : i64} {
  func.func @_mlp_kernel(%arg0: i32, %arg1: i32, %arg2: memref<8x128xf32, #tpu.memory_space<vmem>>, %arg3: memref<128x128xf32, #tpu.memory_space<vmem>>, %arg4: memref<1x128xf32, #tpu.memory_space<vmem>>, %arg5: memref<1x128x128xf32, #tpu.memory_space<vmem>>, %arg6: memref<1x1x128xf32, #tpu.memory_space<vmem>>, %arg7: memref<128x128xf32, #tpu.memory_space<vmem>>, %arg8: memref<1x128xf32, #tpu.memory_space<vmem>>, %arg9: memref<8x128xf32, #tpu.memory_space<vmem>>, %arg10: memref<8x128xf32, #tpu.memory_space<vmem>>) attributes {dimension_semantics = [#tpu.dimension_semantics<parallel>, #tpu.dimension_semantics<arbitrary>], iteration_bounds = array<i64: 1, 3>, scalar_prefetch = 0 : i64, scratch_operands = 1 : i64, tpu.core_type = #tpu.core_type<tc>, window_params = [{transform_indices = @transform_0, window_bounds = array<i64: 8, 128>}, {pipeline_mode = #tpu.pipeline_mode<synchronous>, transform_indices = @transform_1, window_bounds = array<i64: 128, 128>}, {pipeline_mode = #tpu.pipeline_mode<synchronous>, transform_indices = @transform_2, window_bounds = array<i64: 1, 128>}, {transform_indices = @transform_3, window_bounds = array<i64: 1, 128, 128>}, {transform_indices = @transform_4, window_bounds = array<i64: 1, 1, 128>}, {pipeline_mode = #tpu.pipeline_mode<synchronous>, transform_indices = @transform_5, window_bounds = array<i64: 128, 128>}, {pipeline_mode = #tpu.pipeline_mode<synchronous>, transform_indices = @transform_6, window_bounds = array<i64: 1, 128>}, {transform_indices = @transform_7, window_bounds = array<i64: 8, 128>}]} {
    %c0_i32 = arith.constant 0 : i32
    %0 = arith.cmpi eq, %arg1, %c0_i32 : i32
    %1 = arith.extui %0 : i1 to i32
    %c0_i32_0 = arith.constant 0 : i32
    %2 = arith.cmpi ne, %1, %c0_i32_0 : i32
    scf.if %2 {
      %c0_13 = arith.constant 0 : index
      %c0_14 = arith.constant 0 : index
      %20 = vector.load %arg2[%c0_13, %c0_14] : memref<8x128xf32, #tpu.memory_space<vmem>>, vector<8x128xf32>
      %c0_15 = arith.constant 0 : index
      %c0_16 = arith.constant 0 : index
      %21 = vector.load %arg3[%c0_15, %c0_16] : memref<128x128xf32, #tpu.memory_space<vmem>>, vector<128x128xf32>
      %cst_17 = arith.constant dense<0.000000e+00> : vector<8x128xf32>
      %22 = tpu.matmul %20, %21, %cst_17 {dimension_numbers = #tpu.dot_dimension_numbers<[1], [0], [0], [1], [0, 0, 1, 1], [], []>} : vector<8x128xf32>, vector<128x128xf32>, vector<8x128xf32> -> vector<8x128xf32>
      %c0_18 = arith.constant 0 : index
      %c0_19 = arith.constant 0 : index
      %23 = vector.load %arg4[%c0_18, %c0_19] : memref<1x128xf32, #tpu.memory_space<vmem>>, vector<1x128xf32>
      %24 = vector.broadcast %23 : vector<1x128xf32> to vector<8x128xf32>
      %25 = arith.addf %22, %24 : vector<8x128xf32>
      %c0_20 = arith.constant 0 : index
      %c0_21 = arith.constant 0 : index
      %26 = vector.load %arg10[%c0_20, %c0_21] : memref<8x128xf32, #tpu.memory_space<vmem>>, vector<8x128xf32>
      tpu.vector_store %arg10[%c0_20, %c0_21], %25 {strides = array<i32>} : memref<8x128xf32, #tpu.memory_space<vmem>>, vector<8x128xf32>,
    } else {
    }
    %c0 = arith.constant 0 : index
    %c0_1 = arith.constant 0 : index
    %3 = vector.load %arg10[%c0, %c0_1] : memref<8x128xf32, #tpu.memory_space<vmem>>, vector<8x128xf32>
    %c0_2 = arith.constant 0 : index
    %c0_3 = arith.constant 0 : index
    %c0_4 = arith.constant 0 : index
    %4 = vector.load %arg5[%c0_2, %c0_3, %c0_4] : memref<1x128x128xf32, #tpu.memory_space<vmem>>, vector<1x128x128xf32>
    %5 = vector.shape_cast %4 : vector<1x128x128xf32> to vector<128x128xf32>
    %cst = arith.constant dense<0.000000e+00> : vector<8x128xf32>
    %6 = tpu.matmul %3, %5, %cst {dimension_numbers = #tpu.dot_dimension_numbers<[1], [0], [0], [1], [0, 0, 1, 1], [], []>} : vector<8x128xf32>, vector<128x128xf32>, vector<8x128xf32> -> vector<8x128xf32>
    %c0_5 = arith.constant 0 : index
    %c0_6 = arith.constant 0 : index
    %c0_7 = arith.constant 0 : index
    %7 = vector.load %arg6[%c0_5, %c0_6, %c0_7] : memref<1x1x128xf32, #tpu.memory_space<vmem>>, vector<1x1x128xf32>
    %8 = vector.shape_cast %7 : vector<1x1x128xf32> to vector<1x128xf32>
    %9 = vector.broadcast %8 : vector<1x128xf32> to vector<8x128xf32>
    %10 = arith.addf %6, %9 : vector<8x128xf32>
    %c2_i32 = arith.constant 2 : i32
    %11 = arith.cmpi slt, %arg1, %c2_i32 : i32
    %12 = arith.extui %11 : i1 to i32
    %c0_i32_8 = arith.constant 0 : i32
    %13 = arith.cmpi ne, %12, %c0_i32_8 : i32
    scf.if %13 {
      %cst_13 = arith.constant 0.000000e+00 : f32
      %20 = vector.broadcast %cst_13 : f32 to vector<8x128xf32>
      %21 = arith.maximumf %10, %20 : vector<8x128xf32>
      %c0_14 = arith.constant 0 : index
      %c0_15 = arith.constant 0 : index
      %22 = vector.load %arg10[%c0_14, %c0_15] : memref<8x128xf32, #tpu.memory_space<vmem>>, vector<8x128xf32>
      tpu.vector_store %arg10[%c0_14, %c0_15], %21 {strides = array<i32>} : memref<8x128xf32, #tpu.memory_space<vmem>>, vector<8x128xf32>,
    } else {
    }
    %c2_i32_9 = arith.constant 2 : i32
    %14 = arith.cmpi sge, %arg1, %c2_i32_9 : i32
    %15 = arith.extui %14 : i1 to i32
    %c0_i32_10 = arith.constant 0 : i32
    %16 = arith.cmpi ne, %15, %c0_i32_10 : i32
    scf.if %16 {
      %c0_13 = arith.constant 0 : index
      %c0_14 = arith.constant 0 : index
      %20 = vector.load %arg10[%c0_13, %c0_14] : memref<8x128xf32, #tpu.memory_space<vmem>>, vector<8x128xf32>
      tpu.vector_store %arg10[%c0_13, %c0_14], %10 {strides = array<i32>} : memref<8x128xf32, #tpu.memory_space<vmem>>, vector<8x128xf32>,
    } else {
    }
    %c2_i32_11 = arith.constant 2 : i32
    %17 = arith.cmpi eq, %arg1, %c2_i32_11 : i32
    %18 = arith.extui %17 : i1 to i32
    %c0_i32_12 = arith.constant 0 : i32
    %19 = arith.cmpi ne, %18, %c0_i32_12 : i32
    scf.if %19 {
      %c0_13 = arith.constant 0 : index
      %c0_14 = arith.constant 0 : index
      %20 = vector.load %arg10[%c0_13, %c0_14] : memref<8x128xf32, #tpu.memory_space<vmem>>, vector<8x128xf32>
      %c0_15 = arith.constant 0 : index
      %c0_16 = arith.constant 0 : index
      %21 = vector.load %arg7[%c0_15, %c0_16] : memref<128x128xf32, #tpu.memory_space<vmem>>, vector<128x128xf32>
      %cst_17 = arith.constant dense<0.000000e+00> : vector<8x128xf32>
      %22 = tpu.matmul %20, %21, %cst_17 {dimension_numbers = #tpu.dot_dimension_numbers<[1], [0], [0], [1], [0, 0, 1, 1], [], []>} : vector<8x128xf32>, vector<128x128xf32>, vector<8x128xf32> -> vector<8x128xf32>
      %c0_18 = arith.constant 0 : index
      %c0_19 = arith.constant 0 : index
      %23 = vector.load %arg8[%c0_18, %c0_19] : memref<1x128xf32, #tpu.memory_space<vmem>>, vector<1x128xf32>
      %24 = vector.broadcast %23 : vector<1x128xf32> to vector<8x128xf32>
      %25 = arith.addf %22, %24 : vector<8x128xf32>
      %c0_20 = arith.constant 0 : index
      %c0_21 = arith.constant 0 : index
      %26 = vector.load %arg9[%c0_20, %c0_21] : memref<8x128xf32, #tpu.memory_space<vmem>>, vector<8x128xf32>
      tpu.vector_store %arg9[%c0_20, %c0_21], %25 {strides = array<i32>} : memref<8x128xf32, #tpu.memory_space<vmem>>, vector<8x128xf32>,
    } else {
    }
    return
  }
  func.func @transform_0(%arg0: i32, %arg1: i32) -> (i32, i32) {
    %c0_i32 = arith.constant 0 : i32
    %c0_i32_0 = arith.constant 0 : i32
    return %arg0, %c0_i32 : i32, i32
  }
  func.func @transform_1(%arg0: i32, %arg1: i32) -> (i32, i32) {
    %c0_i32 = arith.constant 0 : i32
    %c0_i32_0 = arith.constant 0 : i32
    %c0_i32_1 = arith.constant 0 : i32
    return %c0_i32, %c0_i32_0 : i32, i32
  }
  func.func @transform_2(%arg0: i32, %arg1: i32) -> (i32, i32) {
    %c0_i32 = arith.constant 0 : i32
    %c0_i32_0 = arith.constant 0 : i32
    %c0_i32_1 = arith.constant 0 : i32
    return %c0_i32, %c0_i32_0 : i32, i32
  }
  func.func @transform_3(%arg0: i32, %arg1: i32) -> (i32, i32, i32) {
    %c0_i32 = arith.constant 0 : i32
    %c0_i32_0 = arith.constant 0 : i32
    %c0_i32_1 = arith.constant 0 : i32
    return %arg1, %c0_i32, %c0_i32_0 : i32, i32, i32
  }
  func.func @transform_4(%arg0: i32, %arg1: i32) -> (i32, i32, i32) {
    %c0_i32 = arith.constant 0 : i32
    %c0_i32_0 = arith.constant 0 : i32
    %c0_i32_1 = arith.constant 0 : i32
    return %arg1, %c0_i32, %c0_i32_0 : i32, i32, i32
  }
  func.func @transform_5(%arg0: i32, %arg1: i32) -> (i32, i32) {
    %c0_i32 = arith.constant 0 : i32
    %c0_i32_0 = arith.constant 0 : i32
    %c0_i32_1 = arith.constant 0 : i32
    return %c0_i32, %c0_i32_0 : i32, i32
  }
  func.func @transform_6(%arg0: i32, %arg1: i32) -> (i32, i32) {
    %c0_i32 = arith.constant 0 : i32
    %c0_i32_0 = arith.constant 0 : i32
    %c0_i32_1 = arith.constant 0 : i32
    return %c0_i32, %c0_i32_0 : i32, i32
  }
  func.func @transform_7(%arg0: i32, %arg1: i32) -> (i32, i32) {
    %c0_i32 = arith.constant 0 : i32
    %c0_i32_0 = arith.constant 0 : i32
    return %arg0, %c0_i32 : i32, i32
  }
}

</mosaic_0001>

<bundles_post_ra>
// kernel: tpu_custom_call.1
= control target key start
LH: loop header
LB: loop body
LE: loop exit
PB: predicated region body
PF: predicated region fallthrough
CT: control target
= control target key end

     0   :  { %s1517_s0 = inlined_call_operand.hbm [shape: f32[8,128], index: 0, kind: input, shape index: {}]   ;;  %s1518_s1 = inlined_call_operand.hbm [shape: f32[128,128], index: 1, kind: input, shape index: {}]   ;;  %s1519_s2 = inlined_call_operand.vmem [shape: f32[1,128], index: 2, kind: input, shape index: {}]   ;;  %s1520_s3 = inlined_call_operand.hbm [shape: f32[3,128,128], index: 3, kind: input, shape index: {}]   ;;  %s1521_s4 = inlined_call_operand.vmem [shape: f32[3,1,128], index: 4, kind: input, shape index: {}]   ;;  %s1522_s5 = inlined_call_operand.hbm [shape: f32[128,128], index: 5, kind: input, shape index: {}]   ;;  %s1523_s6 = inlined_call_operand.vmem [shape: f32[1,128], index: 6, kind: input, shape index: {}]   ;;  %s1524_s7 = inlined_call_operand.hbm [shape: f32[8,128], index: 7, kind: output, shape index: {}]  }
   0x1   :  { %1531 = sst [smem:[#allocation16_spill]] %s1517_s0 }
   0x2   :  { %1532 = sst [smem:[#allocation17_spill]] %s1518_s1 }
   0x3   :  { %12 = vsyncpa [#allocation4], 0 }
   0x4   :  { %13 = vsyncpa [#allocation7], 0 }
   0x5   :  { %14 = vsyncpa [#allocation5], 0  ;;  %s1308_s24 = smov 0   ;;  %s1310_s25 = smov 0  }
   0x6   :  { %s1312_s26 = smov 0   ;;  %s1314_s27 = smov 0  }
   0x7   :  { %s1316_s28 = smov 0   ;;  %s1318_s29 = smov 0  }
   0x8 LB: > { %s1337_s30 = sadd.s32 4294967295, %s1253_s29   ;;  %p114_p0 = scmp.ne.s32.totalorder %s1241_s26, %s1237_s25  ;;  %s1253_s29 = sphi %s1318_s29, %s20_s29   ;;  %s1249_s28 = sphi %s1316_s28, %s1554_s28   ;;  %s1245_s27 = sphi %s1314_s27, %s1553_s27   ;;  %s1241_s26 = sphi %s1312_s26, %s1552_s26   ;;  %s1237_s25 = sphi %s1310_s25, %s1551_s25   ;;  %s1233_s24 = sphi %s1308_s24, %s1550_s24  }
   0x9   : > { %p115_p1 = scmp.eq.s32.totalorder %s1253_s29, 0  ;;  %p120_p2 = scmp.ne.s32.totalorder %s1237_s25, %s1233_s24 }
   0xa   : > { %p1525_p3 = scmp.eq.s32.totalorder %s1337_s30, 0  ;;  %p775_p4 = scmp.ge.s32.totalorder %s1253_s29, 1 }
   0xb   : > { %p116_p5 = por %p115_p1, %p114_p0  ;;  %p225_p6 = scmp.lt.s32.totalorder %s1253_s29, 4 }
   0xc   : > { %p1348_p7 = por %p1525_p3, %p120_p2  ;;  %s1255_s10 = smov [#allocation3]  }
   0xd   : > { %p1352_p8 = pnand %p775_p4, %p225_p6  ;;  %s240_s11 = sshll.u32 %s1255_s10, 4  ;;  %s241_s11 = int_to_ptr.vmem [resolvable:$true] %s240_s11 }
   0xe   : > { %s1533_s8 = scalar_select %p1348_p7, 1, 0 }
   0xf   : > { %s1534_s9 = scalar_select %p1352_p8, 1, 0 }
  0x10   : > { %p974_p9 = pneg %p1352_p8  ;;  %p991_p10 = scmp.lt.s32.totalorder %s1253_s29, 3 }
  0x11   : > { %s1256_s13 = smov [#allocation6]   ;;  %s1068_s16 = scalar_lea.vmem %s241_s11, 128 }
  0x12   : > { %p1361_p11 = pnand %p974_p9, %p1525_p3  ;;  %s250_s14 = sshll.u32 %s1256_s13, 4  ;;  %s251_s14 = int_to_ptr.vmem [resolvable:$true] %s250_s14 }
  0x13   : > { %p1365_p12 = pnand %p991_p10, %p116_p5  ;;  %p1069_p0 = scmp.ne.s32.totalorder %s241_s11, %s1068_s16 }
  0x14   : > { %p1059_p13 = pneg %p1361_p11  ;;  %p1076_p4 = scmp.lt.s32.totalorder %s241_s11, %s241_s11 }
  0x15   : > { %s1536_s15 = scalar_select %p1365_p12, 1, 0 }
  0x16   : > { %p1071_p1 = pnand %p1069_p0, %p1059_p13  ;;  %p1077_p6 = scmp.lt.s32.totalorder %s1068_s16, %s1068_s16 }
  0x18   : > { %p1072_p2 = pneg %p1071_p1  ;;  %p1078_p9 = por %p1077_p6, %p1076_p4 }
  0x1a   : > { %p1079_p3 = pnand %p1078_p9, %p1072_p2 }
  0x1c   : > { %1082 = shalt.err (!%p1079_p3)
}
  0x1d   : > { %s1537_s0 = sld [smem:[#allocation16_spill]]  ;;  %s1094_s19 = scalar_lea.vmem %s251_s14, 2048 }
  0x1e   : > { %p1095_p5 = scmp.ne.s32.totalorder %s251_s14, %s1094_s19  ;;  %p1102_p0 = scmp.lt.s32.totalorder %s251_s14, %s251_s14 }
  0x1f   : > { %p1103_p1 = scmp.lt.s32.totalorder %s1094_s19, %s1094_s19 }
  0x20   : > { %p1097_p10 = pnand %p1095_p5, %p1059_p13 }
  0x21   : > { %p1104_p8 = por %p1103_p1, %p1102_p0 }
  0x22   : > { %p1098_p7 = pneg %p1097_p10 }
  0x23   : > { %977 = dma.hbm_to_vmem [thread:$0]  (!%p1361_p11), %s1537_s0, 128, %s241_s11, [#allocation4]  }
  0x24   : > { %p1105_p12 = pnand %p1104_p8, %p1098_p7 }
  0x26   : > { %1108 = shalt.err (!%p1105_p12)
}
  0x27   : > { %s1529_s20 = smov 128   ;;  %s1530_s21 = smov 8  }
  0x28   : > { %s1538_s1 = sld [smem:[#allocation17_spill]]  ;;  %s1259_s24 = smov [#allocation9]  }
  0x29   : > { %s266_s10 = sshll.u32 %s1259_s24, 4  ;;  %s29_s11 = sadd.s32 1, %s1249_s28  ;;  %s267_s10 = int_to_ptr.vmem [resolvable:$true] %s266_s10 }
  0x2a   : > { %s1120_s13 = scalar_lea.vmem %s267_s10, 2048  ;;  %p1128_p12 = scmp.lt.s32.totalorder %s267_s10, %s267_s10 }
  0x2b   : > { %p1121_p3 = scmp.ne.s32.totalorder %s267_s10, %s1120_s13  ;;  %p1129_p2 = scmp.lt.s32.totalorder %s1120_s13, %s1120_s13 }
  0x2d   : > { %p1123_p7 = pnand %p1121_p3, %p1059_p13  ;;  %p1130_p4 = por %p1129_p2, %p1128_p12 }
  0x2e   : > { %980 = dma.hbm_to_vmem [thread:$0]  (!%p1361_p11), %s1538_s1, 2048, %s251_s14, [#allocation7], %s1529_s20, %s1529_s20, %s1530_s21  }
  0x2f   : > { %p1124_p8 = pneg %p1123_p7 }
  0x31   : > { %p1131_p6 = pnand %p1130_p4, %p1124_p8 }
  0x33   : > { %1134 = shalt.err (!%p1131_p6)
}
  0x34   : > { %983 = dma.hbm_to_vmem [thread:$0]  (!%p1361_p11), %s1522_s5, 2048, %s267_s10, [#allocation7], %s1529_s20, %s1529_s20, %s1530_s21  }
  0x35   : > { %p30_p13 = scmp.ge.s32.totalorder %s29_s11, 3  ;;  %s107_s17 = sadd.s32 1, %s1241_s26 }
  0x36   : > { %s283_s18 = sand.u32 1, %s1253_s29   ;;  %s285_s19 = sand.u32 1, %s1241_s26  }
  0x37   : > { %s1556_s11 = smov (%p30_p13, %s29_s11), 0  ;;  %s780_s12 = sshll.u32 %s285_s19, 7 }
  0x38   : > { %s104_s22 = ssub.s32 %s1249_s28, %s1556_s11  ;;  %s799_s23 = sshll.u32 %s1249_s28, 11 }
  0x39   : > { %p105_p9 = scmp.eq.s32.totalorder %s104_s22, 0  ;;  %s293_s14 = scalar_lea.hbm %s1520_s3, %s799_s23 }
  0x3a   : > { %s287_s16 = scalar_lea.vmem [#allocation8], %s780_s12  ;;  %s284_s10 = scalar_lea.sflag [#allocation4], %s283_s18 }
  0x3b   : > { %s294_s0 = sshll.u32 %s287_s16, 4  ;;  %p1539_p11 = scmp.ne.s32.totalorder %s1536_s15, 0  ;;  %s295_s0 = int_to_ptr.vmem [resolvable:$true] %s294_s0 }
  0x3c   : > { %s1414_s1 = scalar_select %p105_p9, %s1241_s26, %s107_s17  }
  0x3d   : > { %p1137_p5 = pneg %p1539_p11  ;;  %s1148_s20 = scalar_lea.vmem %s295_s0, 2048 }
  0x3e   : > { %p1149_p10 = scmp.ne.s32.totalorder %s295_s0, %s1148_s20  ;;  %s1260_s19 = smov [#allocation8]  }
  0x3f   : > { %s1153_s21 = sshll.u32 %s1260_s19, 4  ;;  %s1154_s21 = int_to_ptr.vmem [resolvable:$false] %s1153_s21 }
  0x40   : > { %p1151_p0 = pnand %p1149_p10, %p1137_p5  ;;  %s1155_s22 = scalar_lea.vmem %s1154_s21, 4096 }
  0x41   : > { %p1156_p3 = scmp.lt.s32.totalorder %s295_s0, %s1154_s21  ;;  %p1157_p7 = scmp.lt.s32.totalorder %s1155_s22, %s1148_s20 }
  0x42   : > { %p1152_p1 = pneg %p1151_p0 }
  0x43   : > { %p1158_p8 = por %p1157_p7, %p1156_p3 }
  0x45   : > { %p1159_p12 = pnand %p1158_p8, %p1152_p1 }
  0x47   : > { %1162 = shalt.err (!%p1159_p12)
}
  0x48   : > { %s1540_s17 = smov 8   ;;  %s1541_s12 = smov 128  }
  0x49   : > { %987 = dma.hbm_to_vmem [thread:$0]  (!%p1539_p11), %s293_s14, 2048, %s295_s0, %s284_s10, %s1541_s12, %s1541_s12, %s1540_s17  }
  0x4a   : > { %p1542_p2 = scmp.ne.s32.totalorder %s1534_s9, 0 }
  0x4b   : > { %p1543_p4 = scmp.eq.s32.totalorder (!%p1542_p2), %s1337_s30, 0 }
  0x4c   : > { %312 = sbr.rel (%p1542_p2) target bundleno = 818 (0x332), region = 48 }
  0x51   : > { %1212 = dma.done.wait (%p1543_p4), [#allocation4], 128   ;;  %p1544_p6 = pmov %p1543_p4 }
  0x52   : > { %p1545_p13 = pmov %p1543_p4 }
  0x53   : > { %1214 = vsyncadd (%p1544_p6), [#allocation4], 4294967168 }
  0x54   : > { %1216 = dma.done.wait (%p1545_p13), [#allocation7], 2048   ;;  %p1546_p9 = pmov %p1543_p4 }
  0x55   : > { %s322_s15 = sand.u32 1, %s1337_s30   ;;  %s324_s0 = sand.u32 1, %s1237_s25  }
  0x56   : > { %1218 = vsyncadd (%p1546_p9), [#allocation7], 4294965248  ;;  %s786_s20 = sshll.u32 %s324_s0, 7  ;;  %s323_s9 = scalar_lea.sflag [#allocation4], %s322_s15 }
  0x57   : > { %s1435_s21 = scalar_lea.vmem [#allocation8], %s786_s20  ;;  %p1547_p11 = scmp.ne.s32.totalorder %s1533_s8, 0 }
  0x59   : > { %1220 = dma.done.wait (%p1547_p11), %s323_s9, 2048  }
  0x5a   : > { %1222 = vsyncadd (%p1547_p11), %s323_s9, 4294965248  ;;  %p1548_p5 = pmov %p1543_p4 }
  0x5b   : > { %p1549_p10 = pmov %p1543_p4 }
  0x5c   : > { %1224 = dma.done.wait (%p1548_p5), [#allocation7], 2048  }
  0x5d   : > { %1226 = vsyncadd (%p1549_p10), [#allocation7], 4294965248  ;;  %p359_p0 = scmp.lt.s32.totalorder %s1245_s27, 2  ;;  %p788_p1 = scmp.ne.s32.totalorder %s1245_s27, 0 }
  0x5f   : > { %s1449_s18 = scalar_select %p359_p0, %s1245_s27, 2 }
  0x60   : > { %365 = sbr.rel (%p788_p1) target bundleno = 330 (0x14a), region = 68 }
  0x61   : > { %s361_s13 = scalar_lea.vmem %s1521_s4, %s1449_s18 }
  0x65   : > { %v382_v0 = vld [vmem:[#allocation6 + $0x78] sm:$0xff]  ;;  %v1261_v1 = vmov 0.0   ;;  %v381_v2 = vld [vmem:[#allocation6 + $0x70] sm:$0xff]  ;;  %vm1262_vm0 = vmmov 0   ;;  %v380_v3 = vld [vmem:[#allocation6 + $0x68] sm:$0xff] }
  0x66   : > { %851 = vmatprep.subr.mxu0 %v1261_v1  ;;  %883 = vmatprep.mubr.msk.f32.mxu0 %vm1262_vm0, %v1261_v1  ;;  %v379_v4 = vld [vmem:[#allocation6 + $0x60] sm:$0xff]  ;;  %v378_v5 = vld [vmem:[#allocation6 + $0x58] sm:$0xff]  ;;  %v377_v6 = vld [vmem:[#allocation6 + $0x50] sm:$0xff] }
  0x67   : > { %852 = vmatpush3.msra.mxu0 %v382_v0  ;;  %v376_v7 = vld [vmem:[#allocation6 + $0x48] sm:$0xff]  ;;  %v375_v8 = vld [vmem:[#allocation6 + $0x40] sm:$0xff]  ;;  %v374_v9 = vld [vmem:[#allocation6 + $0x38] sm:$0xff] }
  0x68   : > { %853 = vmatprep.subr.mxu0 %v1261_v1  ;;  %v373_v10 = vld [vmem:[#allocation6 + $0x30] sm:$0xff]  ;;  %v372_v11 = vld [vmem:[#allocation6 + $0x28] sm:$0xff]  ;;  %v371_v12 = vld [vmem:[#allocation6 + $0x20] sm:$0xff] }
  0x69   : > { %854 = vmatpush3.msra.mxu0 %v381_v2  ;;  %v370_v13 = vld [vmem:[#allocation6 + $0x18] sm:$0xff]  ;;  %v369_v14 = vld [vmem:[#allocation6 + $0x10] sm:$0xff]  ;;  %v368_v15 = vld [vmem:[#allocation6 + $0x8] sm:$0xff] }
  0x6a   : > { %855 = vmatprep.subr.mxu0 %v1261_v1  ;;  %v367_v16 = vld [vmem:[#allocation6] sm:$0xff]  ;;  %v366_v17 = vld [vmem:[#allocation3] sm:$0xff]  ;;  %v789_v18 = vld [vmem:[%s1519_s2] ss:$0 sm:$0xff] }
  0x6b   : > { %856 = vmatpush3.msra.mxu0 %v380_v3 }
  0x6c   : > { %857 = vmatprep.subr.mxu0 %v1261_v1 }
  0x6d   : > { %858 = vmatpush3.msra.mxu0 %v379_v4 }
  0x6e   : > { %859 = vmatprep.subr.mxu0 %v1261_v1 }
  0x6f   : > { %860 = vmatpush3.msra.mxu0 %v378_v5 }
  0x70   : > { %861 = vmatprep.subr.mxu0 %v1261_v1 }
  0x71   : > { %862 = vmatpush3.msra.mxu0 %v377_v6 }
  0x72   : > { %863 = vmatprep.subr.mxu0 %v1261_v1 }
  0x73   : > { %864 = vmatpush3.msra.mxu0 %v376_v7 }
  0x74   : > { %865 = vmatprep.subr.mxu0 %v1261_v1 }
  0x75   : > { %866 = vmatpush3.msra.mxu0 %v375_v8 }
  0x76   : > { %867 = vmatprep.subr.mxu0 %v1261_v1 }
  0x77   : > { %868 = vmatpush3.msra.mxu0 %v374_v9 }
  0x78   : > { %869 = vmatprep.subr.mxu0 %v1261_v1 }
  0x79   : > { %870 = vmatpush3.msra.mxu0 %v373_v10 }
  0x7a   : > { %871 = vmatprep.subr.mxu0 %v1261_v1 }
  0x7b   : > { %872 = vmatpush3.msra.mxu0 %v372_v11 }
  0x7c   : > { %873 = vmatprep.subr.mxu0 %v1261_v1 }
  0x7d   : > { %874 = vmatpush3.msra.mxu0 %v371_v12 }
  0x7e   : > { %875 = vmatprep.subr.mxu0 %v1261_v1 }
  0x7f   : > { %876 = vmatpush3.msra.mxu0 %v370_v13 }
  0x80   : > { %877 = vmatprep.subr.mxu0 %v1261_v1 }
  0x81   : > { %878 = vmatpush3.msra.mxu0 %v369_v14 }
  0x82   : > { %879 = vmatprep.subr.mxu0 %v1261_v1 }
  0x83   : > { %880 = vmatpush3.msra.mxu0 %v368_v15 }
  0x84   : > { %881 = vmatprep.subr.mxu0 %v1261_v1 }
  0x85   : > { %882 = vmatpush3.msra.mxu0 %v367_v16 }
  0x86   : > { %884 = vmatmul.mubr.f32.vlgmr.msra.gmra.mxu0 %v366_v17 }
 0x146   : > { %v456_v19 = vpop.f32.mrf.mxu0 }
 0x147   : > { %v457_v20 = vadd.f32 %v789_v18, %v456_v19 }
 0x148   : > { %v885_v21 = vpop.f32.mrf.mxu0 }
 0x149   : > { %460 = vst [vmem:[#allocation2] sm:$0xff] %v457_v20 }
 0x14a PF: > { %v477_v22 = vld [vmem:[%s1435_s21 + $0x78] sm:$0xff]  ;;  %v1263_v23 = vmov 0.0   ;;  %v476_v24 = vld [vmem:[%s1435_s21 + $0x70] sm:$0xff]  ;;  %vm1264_vm1 = vmmov 0   ;;  %v475_v25 = vld [vmem:[%s1435_s21 + $0x68] sm:$0xff]  ;;  %p791_p3 = scmp.ge.s32.totalorder %s1245_s27, 2 }
 0x14b   : > { %886 = vmatprep.subr.mxu0 %v1263_v23  ;;  %918 = vmatprep.mubr.msk.f32.mxu0 %vm1264_vm1, %v1263_v23  ;;  %v474_v26 = vld [vmem:[%s1435_s21 + $0x60] sm:$0xff]  ;;  %v473_v27 = vld [vmem:[%s1435_s21 + $0x58] sm:$0xff]  ;;  %v472_v28 = vld [vmem:[%s1435_s21 + $0x50] sm:$0xff] }
 0x14c   : > { %887 = vmatpush3.msra.mxu0 %v477_v22  ;;  %v471_v29 = vld [vmem:[%s1435_s21 + $0x48] sm:$0xff]  ;;  %v470_v30 = vld [vmem:[%s1435_s21 + $0x40] sm:$0xff]  ;;  %v469_v31 = vld [vmem:[%s1435_s21 + $0x38] sm:$0xff] }
 0x14d   : > { %888 = vmatprep.subr.mxu0 %v1263_v23  ;;  %v468_v32 = vld [vmem:[%s1435_s21 + $0x30] sm:$0xff]  ;;  %v467_v33 = vld [vmem:[%s1435_s21 + $0x28] sm:$0xff]  ;;  %v466_v34 = vld [vmem:[%s1435_s21 + $0x20] sm:$0xff] }
 0x14e   : > { %889 = vmatpush3.msra.mxu0 %v476_v24  ;;  %v465_v35 = vld [vmem:[%s1435_s21 + $0x18] sm:$0xff]  ;;  %v464_v36 = vld [vmem:[%s1435_s21 + $0x10] sm:$0xff]  ;;  %v463_v37 = vld [vmem:[%s1435_s21 + $0x8] sm:$0xff] }
 0x14f   : > { %890 = vmatprep.subr.mxu0 %v1263_v23  ;;  %v462_v38 = vld [vmem:[%s1435_s21] sm:$0xff]  ;;  %v790_v40 = vld [vmem:[%s361_s13] ss:$0 sm:$0xff] }
 0x150   : > { %891 = vmatpush3.msra.mxu0 %v475_v25  ;;  %v461_v39 = vld [vmem:[#allocation2] sm:$0xff] }
 0x151   : > { %892 = vmatprep.subr.mxu0 %v1263_v23 }
 0x152   : > { %893 = vmatpush3.msra.mxu0 %v474_v26 }
 0x153   : > { %894 = vmatprep.subr.mxu0 %v1263_v23 }
 0x154   : > { %895 = vmatpush3.msra.mxu0 %v473_v27 }
 0x155   : > { %896 = vmatprep.subr.mxu0 %v1263_v23 }
 0x156   : > { %897 = vmatpush3.msra.mxu0 %v472_v28 }
 0x157   : > { %898 = vmatprep.subr.mxu0 %v1263_v23 }
 0x158   : > { %899 = vmatpush3.msra.mxu0 %v471_v29 }
 0x159   : > { %900 = vmatprep.subr.mxu0 %v1263_v23 }
 0x15a   : > { %901 = vmatpush3.msra.mxu0 %v470_v30 }
 0x15b   : > { %902 = vmatprep.subr.mxu0 %v1263_v23 }
 0x15c   : > { %903 = vmatpush3.msra.mxu0 %v469_v31 }
 0x15d   : > { %904 = vmatprep.subr.mxu0 %v1263_v23 }
 0x15e   : > { %905 = vmatpush3.msra.mxu0 %v468_v32 }
 0x15f   : > { %906 = vmatprep.subr.mxu0 %v1263_v23 }
 0x160   : > { %907 = vmatpush3.msra.mxu0 %v467_v33 }
 0x161   : > { %908 = vmatprep.subr.mxu0 %v1263_v23 }
 0x162   : > { %909 = vmatpush3.msra.mxu0 %v466_v34 }
 0x163   : > { %910 = vmatprep.subr.mxu0 %v1263_v23 }
 0x164   : > { %911 = vmatpush3.msra.mxu0 %v465_v35 }
 0x165   : > { %912 = vmatprep.subr.mxu0 %v1263_v23 }
 0x166   : > { %913 = vmatpush3.msra.mxu0 %v464_v36 }
 0x167   : > { %914 = vmatprep.subr.mxu0 %v1263_v23 }
 0x168   : > { %915 = vmatpush3.msra.mxu0 %v463_v37 }
 0x169   : > { %916 = vmatprep.subr.mxu0 %v1263_v23 }
 0x16a   : > { %917 = vmatpush3.msra.mxu0 %v462_v38 }
 0x16b   : > { %919 = vmatmul.mubr.f32.vlgmr.msra.gmra.mxu0 %v461_v39 }
 0x229   : > { %558 = sbr.rel (%p791_p3) target bundleno = 561 (0x231), region = 72 }
 0x22b   : > { %v551_v41 = vpop.f32.mrf.mxu0 }
 0x22c   : > { %v552_v42 = vadd.f32 %v790_v40, %v551_v41 }
 0x22d   : > { %v920_v43 = vpop.f32.mrf.mxu0 }
 0x22e   : > { %v559_v44 = vmax.f32 %v552_v42, 0.0 }
 0x230   : > { %560 = vst [vmem:[#allocation2] sm:$0xff] %v559_v44 }
 0x231 PF: > { %564 = sbr.rel (%p359_p0) target bundleno = 567 (0x237), region = 76 }
 0x236   : > { %565 = vst [vmem:[#allocation2] sm:$0xff] %v552_v42 }
 0x237 PF: > { %p793_p7 = scmp.ne.s32.totalorder %s1245_s27, 2 }
 0x239   : > { %569 = sbr.rel (%p793_p7) target bundleno = 803 (0x323), region = 80 }
 0x23e   : > { %v586_v45 = vld [vmem:[#allocation9 + $0x78] sm:$0xff]  ;;  %v1265_v46 = vmov 0.0   ;;  %v585_v47 = vld [vmem:[#allocation9 + $0x70] sm:$0xff]  ;;  %vm1266_vm2 = vmmov 0   ;;  %v584_v48 = vld [vmem:[#allocation9 + $0x68] sm:$0xff] }
 0x23f   : > { %921 = vmatprep.subr.mxu0 %v1265_v46  ;;  %953 = vmatprep.mubr.msk.f32.mxu0 %vm1266_vm2, %v1265_v46  ;;  %v583_v49 = vld [vmem:[#allocation9 + $0x60] sm:$0xff]  ;;  %v582_v50 = vld [vmem:[#allocation9 + $0x58] sm:$0xff]  ;;  %v581_v51 = vld [vmem:[#allocation9 + $0x50] sm:$0xff] }
 0x240   : > { %922 = vmatpush3.msra.mxu0 %v586_v45  ;;  %v580_v52 = vld [vmem:[#allocation9 + $0x48] sm:$0xff]  ;;  %v579_v53 = vld [vmem:[#allocation9 + $0x40] sm:$0xff]  ;;  %v578_v54 = vld [vmem:[#allocation9 + $0x38] sm:$0xff] }
 0x241   : > { %923 = vmatprep.subr.mxu0 %v1265_v46  ;;  %v577_v55 = vld [vmem:[#allocation9 + $0x30] sm:$0xff]  ;;  %v576_v56 = vld [vmem:[#allocation9 + $0x28] sm:$0xff]  ;;  %v575_v57 = vld [vmem:[#allocation9 + $0x20] sm:$0xff] }
 0x242   : > { %924 = vmatpush3.msra.mxu0 %v585_v47  ;;  %v574_v58 = vld [vmem:[#allocation9 + $0x18] sm:$0xff]  ;;  %v573_v59 = vld [vmem:[#allocation9 + $0x10] sm:$0xff]  ;;  %v572_v60 = vld [vmem:[#allocation9 + $0x8] sm:$0xff] }
 0x243   : > { %925 = vmatprep.subr.mxu0 %v1265_v46  ;;  %v571_v61 = vld [vmem:[#allocation9] sm:$0xff]  ;;  %v570_v62 = vld [vmem:[#allocation2] sm:$0xff] }
 0x244   : > { %926 = vmatpush3.msra.mxu0 %v584_v48  ;;  %v794_v63 = vld [vmem:[%s1523_s6] ss:$0 sm:$0xff] }
 0x245   : > { %927 = vmatprep.subr.mxu0 %v1265_v46 }
 0x246   : > { %928 = vmatpush3.msra.mxu0 %v583_v49 }
 0x247   : > { %929 = vmatprep.subr.mxu0 %v1265_v46 }
 0x248   : > { %930 = vmatpush3.msra.mxu0 %v582_v50 }
 0x249   : > { %931 = vmatprep.subr.mxu0 %v1265_v46 }
 0x24a   : > { %932 = vmatpush3.msra.mxu0 %v581_v51 }
 0x24b   : > { %933 = vmatprep.subr.mxu0 %v1265_v46 }
 0x24c   : > { %934 = vmatpush3.msra.mxu0 %v580_v52 }
 0x24d   : > { %935 = vmatprep.subr.mxu0 %v1265_v46 }
 0x24e   : > { %936 = vmatpush3.msra.mxu0 %v579_v53 }
 0x24f   : > { %937 = vmatprep.subr.mxu0 %v1265_v46 }
 0x250   : > { %938 = vmatpush3.msra.mxu0 %v578_v54 }
 0x251   : > { %939 = vmatprep.subr.mxu0 %v1265_v46 }
 0x252   : > { %940 = vmatpush3.msra.mxu0 %v577_v55 }
 0x253   : > { %941 = vmatprep.subr.mxu0 %v1265_v46 }
 0x254   : > { %942 = vmatpush3.msra.mxu0 %v576_v56 }
 0x255   : > { %943 = vmatprep.subr.mxu0 %v1265_v46 }
 0x256   : > { %944 = vmatpush3.msra.mxu0 %v575_v57 }
 0x257   : > { %945 = vmatprep.subr.mxu0 %v1265_v46 }
 0x258   : > { %946 = vmatpush3.msra.mxu0 %v574_v58 }
 0x259   : > { %947 = vmatprep.subr.mxu0 %v1265_v46 }
 0x25a   : > { %948 = vmatpush3.msra.mxu0 %v573_v59 }
 0x25b   : > { %949 = vmatprep.subr.mxu0 %v1265_v46 }
 0x25c   : > { %950 = vmatpush3.msra.mxu0 %v572_v60 }
 0x25d   : > { %951 = vmatprep.subr.mxu0 %v1265_v46 }
 0x25e   : > { %952 = vmatpush3.msra.mxu0 %v571_v61 }
 0x25f   : > { %954 = vmatmul.mubr.f32.vlgmr.msra.gmra.mxu0 %v570_v62 }
 0x31f   : > { %v660_v0 = vpop.f32.mrf.mxu0 }
 0x320   : > { %v661_v1 = vadd.f32 %v794_v63, %v660_v0 }
 0x321   : > { %v955_v2 = vpop.f32.mrf.mxu0 }
 0x322   : > { %664 = vst [vmem:[#allocation10] sm:$0xff] %v661_v1 }
 0x323 PF: > { %p995_p8 = scmp.eq.s32.totalorder %s1337_s30, 2  ;;  %s1267_s22 = smov [#allocation10]  }
 0x324   : > { %s674_s17 = sshll.u32 %s1267_s22, 4  ;;  %s675_s17 = int_to_ptr.vmem [resolvable:$true] %s674_s17 }
 0x325   : > { %s1163_s12 = scalar_lea.vmem %s675_s17, 128  ;;  %p1170_p6 = scmp.lt.s32.totalorder %s675_s17, %s675_s17 }
 0x326   : > { %p1164_p12 = scmp.ne.s32.totalorder %s675_s17, %s1163_s12  ;;  %p1171_p13 = scmp.lt.s32.totalorder %s1163_s12, %s1163_s12 }
 0x328   : > { %p1165_p2 = pnand %p1164_p12, %p995_p8  ;;  %p1172_p9 = por %p1171_p13, %p1170_p6 }
 0x32a   : > { %p1166_p4 = pneg %p1165_p2 }
 0x32c   : > { %p1173_p11 = pnand %p1172_p9, %p1166_p4 }
 0x32e   : > { %1176 = shalt.err (!%p1173_p11)
}
 0x32f   : > { %971 = dma.vmem_to_hbm [thread:$0]  (%p995_p8), %s675_s17, 128, %s1524_s7, [#allocation5]  }
 0x330   : > { %1228 = dma.done.wait (%p995_p8), [#allocation5], 128  }
 0x331   : > { %1230 = vsyncadd (%p995_p8), [#allocation5], 4294967168 }
 0x332 PF: > { %s20_s29 = sadd.s32 1, %s1253_s29   ;;  %s1550_s24 = smov %s1237_s25 }
 0x333   : > { %p17_p5 = scmp.ge.s32.totalorder %s20_s29, 5   ;;  %s1551_s25 = smov %s1241_s26 }
 0x334   : > { %s1552_s26 = smov %s1414_s1  ;;  %s1553_s27 = smov %s1249_s28 }
 0x335   : > { %s1554_s28 = smov %s1556_s11  ;;  %19 = sbr.rel (!%p17_p5) target bundleno = 8 (0x8), region = 117 }
 0x33a   :  { %687 = vsyncpa [#allocation4], 1 }
 0x33b   :  { %689 = vsyncpa [#allocation4 + $0x1], 1 }
 0x33c   :  { %690 = vsyncpa [#allocation7], 1 }
 0x33d   :  { %691 = vsyncpa [#allocation5], 1 }
 0x33e   :  { %693 = vsyncpa [#allocation5 + $0x1], 1 }

</bundles_post_ra>
